<compile_context>
chip_gen: v5e
topology: v5e:2x2
jax: 0.10.0
libtpu: 0.0.40
codegen_flags: <defaults>
</compile_context>

<pallas_src>
import functools

import jax
import jax.numpy as jnp
from jax.experimental import pallas as pl
from jax.experimental.pallas import tpu as pltpu

_LANE = 128


def _round_up(x, m):
    return (x + m - 1) // m * m


def _mlp_kernel(x_ref, w1_ref, b1_ref, w2_ref, b2_ref, w3_ref, b3_ref,
                logit_ref, prob_ref):
    # Layer 1: relu(x @ W1 + b1)  -- bf16 MXU, f32 accumulate, f32 epilogue.
    h1 = jnp.dot(x_ref[...], w1_ref[...], preferred_element_type=jnp.float32)
    h1 = jnp.maximum(h1 + b1_ref[...], 0.0)

    # Layer 2: relu(h1 @ W2 + b2)
    h2 = jnp.dot(h1.astype(jnp.bfloat16), w2_ref[...],
                 preferred_element_type=jnp.float32)
    h2 = jnp.maximum(h2 + b2_ref[...], 0.0)

    # Layer 3 (out_features == 1): contract the single W3 row against h2^T so the
    # result is a lane-dense (1, TILE_B) row rather than a width-1 column.
    logits = jnp.dot(w3_ref[...], h2.astype(jnp.bfloat16).T,
                     preferred_element_type=jnp.float32)          # (1, TILE_B)
    logits = logits + b3_ref[...]

    logit_ref[...] = logits
    # Fused `predict` epilogue: sigmoid uses the otherwise-idle EUP slot.
    prob_ref[...] = 1.0 / (1.0 + jnp.exp(-logits))


@functools.partial(jax.jit, static_argnames=("tile_b",))
def mlp_binary_classifier(x, params, tile_b=512):
    """Forward pass. x: [B, in_size] f32 -> (logits [B,1] f32, probs [B,1] f32)."""
    w1, b1, w2, b2, w3, b3 = params
    B, in_size = x.shape
    h1 = w1.shape[1]
    h2 = w2.shape[1]

    f32, bf16 = jnp.float32, jnp.bfloat16
    h1p = _round_up(h1, _LANE)
    h2p = _round_up(h2, _LANE)

    # Batch tile: multiple of 128 (lane-dense logits row, f32 sublane-friendly).
    tb = _round_up(min(tile_b, _round_up(B, _LANE)), _LANE)
    bp = _round_up(B, tb)

    # Zero-padded, bf16 operands (biases stay f32 for the epilogue).
    xp = jnp.zeros((bp, in_size), bf16).at[:B].set(x.astype(bf16))
    w1p = jnp.zeros((in_size, h1p), bf16).at[:, :h1].set(w1.astype(bf16))
    b1p = jnp.zeros((1, h1p), f32).at[:, :h1].set(b1.astype(f32))
    w2p = jnp.zeros((h1p, h2p), bf16).at[:h1, :h2].set(w2.astype(bf16))
    b2p = jnp.zeros((1, h2p), f32).at[:, :h2].set(b2.astype(f32))
    w3p = jnp.zeros((1, h2p), bf16).at[:, :h2].set(w3.reshape(1, h2).astype(bf16))
    b3p = b3.reshape(1, 1).astype(f32)

    const = lambda i: (0, 0)
    logits_row, probs_row = pl.pallas_call(
        _mlp_kernel,
        out_shape=(jax.ShapeDtypeStruct((1, bp), f32),
                   jax.ShapeDtypeStruct((1, bp), f32)),
        grid=(bp // tb,),
        in_specs=[
            pl.BlockSpec((tb, in_size), lambda i: (i, 0)),   # x tile (pipelined)
            pl.BlockSpec((in_size, h1p), const),             # resident weights
            pl.BlockSpec((1, h1p), const),
            pl.BlockSpec((h1p, h2p), const),
            pl.BlockSpec((1, h2p), const),
            pl.BlockSpec((1, h2p), const),
            pl.BlockSpec((1, 1), const),
        ],
        out_specs=(pl.BlockSpec((1, tb), lambda i: (0, i)),  # lane-dense logits
                   pl.BlockSpec((1, tb), lambda i: (0, i))), # lane-dense probs
        compiler_params=pltpu.CompilerParams(
            dimension_semantics=("parallel",)),
    )(xp, w1p, b1p, w2p, b2p, w3p, b3p)

    logits = logits_row[0, :B].reshape(B, 1)
    probs = probs_row[0, :B].reshape(B, 1)
    return logits, probs


def init_params(key, in_size, h1, h2):
    """PyTorch nn.Linear-like uniform init; weights pre-transposed to [in, out]."""
    ks = jax.random.split(key, 6)

    def linear(kw, kb, fan_in, fan_out):
        bound = 1.0 / jnp.sqrt(fan_in)
        w = jax.random.uniform(kw, (fan_in, fan_out), jnp.float32, -bound, bound)
        b = jax.random.uniform(kb, (1, fan_out), jnp.float32, -bound, bound)
        return w, b

    w1, b1 = linear(ks[0], ks[1], in_size, h1)
    w2, b2 = linear(ks[2], ks[3], h1, h2)
    w3, b3 = linear(ks[4], ks[5], h2, 1)
    return (w1, b1, w2, b2, w3, b3)


if __name__ == "__main__":
    # Small shapes consistent with the module: batch=8, in_size=32, h1=64, h2=32.
    B, IN, H1, H2 = 8, 32, 64, 32

    key = jax.random.PRNGKey(0)
    k_x, k_p = jax.random.split(key)
    x = jax.random.normal(k_x, (B, IN), dtype=jnp.float32)
    params = init_params(k_p, IN, H1, H2)

    logits, probs = mlp_binary_classifier(x, params)
    logits = jax.block_until_ready(logits)
    probs = jax.block_until_ready(probs)

    # Reference with the same bf16 operand rounding / f32 accumulation.
    w1, b1, w2, b2, w3, b3 = params
    bf16 = jnp.bfloat16
    r = jnp.dot(x.astype(bf16), w1.astype(bf16), preferred_element_type=jnp.float32)
    r = jnp.maximum(r + b1, 0.0)
    r = jnp.dot(r.astype(bf16), w2.astype(bf16), preferred_element_type=jnp.float32)
    r = jnp.maximum(r + b2, 0.0)
    ref = jnp.dot(r.astype(bf16), w3.astype(bf16),
                  preferred_element_type=jnp.float32) + b3

    assert logits.shape == (B, 1)
    assert probs.shape == (B, 1)
    assert jnp.allclose(logits, ref, atol=1e-3, rtol=1e-3)
    assert jnp.allclose(probs, jax.nn.sigmoid(ref), atol=1e-3, rtol=1e-3)

    # `predict` semantics: sigmoid > 0.5 -> class 1 (sigmoid already fused in-kernel).
    preds = (probs[:, 0] > 0.5).astype(jnp.int32)
    preds = jax.block_until_ready(preds)
    assert preds.shape == (B,)

    print("KERNEL_OK")
</pallas_src>

<mosaic_0001>
module attributes {stable_mosaic.version = 11 : i64} {
  func.func @_mlp_kernel(%arg0: i32, %arg1: memref<128x32xbf16, #tpu.memory_space<vmem>>, %arg2: memref<32x128xbf16, #tpu.memory_space<vmem>>, %arg3: memref<1x128xf32, #tpu.memory_space<vmem>>, %arg4: memref<128x128xbf16, #tpu.memory_space<vmem>>, %arg5: memref<1x128xf32, #tpu.memory_space<vmem>>, %arg6: memref<1x128xbf16, #tpu.memory_space<vmem>>, %arg7: memref<1x1xf32, #tpu.memory_space<vmem>>, %arg8: memref<1x128xf32, #tpu.memory_space<vmem>>, %arg9: memref<1x128xf32, #tpu.memory_space<vmem>>) attributes {dimension_semantics = [#tpu.dimension_semantics<parallel>], iteration_bounds = array<i64: 1>, scalar_prefetch = 0 : i64, scratch_operands = 0 : i64, tpu.core_type = #tpu.core_type<tc>, window_params = [{transform_indices = @transform_0, window_bounds = array<i64: 128, 32>}, {pipeline_mode = #tpu.pipeline_mode<synchronous>, transform_indices = @transform_1, window_bounds = array<i64: 32, 128>}, {pipeline_mode = #tpu.pipeline_mode<synchronous>, transform_indices = @transform_2, window_bounds = array<i64: 1, 128>}, {pipeline_mode = #tpu.pipeline_mode<synchronous>, transform_indices = @transform_3, window_bounds = array<i64: 128, 128>}, {pipeline_mode = #tpu.pipeline_mode<synchronous>, transform_indices = @transform_4, window_bounds = array<i64: 1, 128>}, {pipeline_mode = #tpu.pipeline_mode<synchronous>, transform_indices = @transform_5, window_bounds = array<i64: 1, 128>}, {pipeline_mode = #tpu.pipeline_mode<synchronous>, transform_indices = @transform_6, window_bounds = array<i64: 1, 1>}, {transform_indices = @transform_7, window_bounds = array<i64: 1, 128>}, {transform_indices = @transform_8, window_bounds = array<i64: 1, 128>}]} {
    %c0 = arith.constant 0 : index
    %c0_0 = arith.constant 0 : index
    %0 = vector.load %arg1[%c0, %c0_0] : memref<128x32xbf16, #tpu.memory_space<vmem>>, vector<128x32xbf16>
    %c0_1 = arith.constant 0 : index
    %c0_2 = arith.constant 0 : index
    %1 = vector.load %arg2[%c0_1, %c0_2] : memref<32x128xbf16, #tpu.memory_space<vmem>>, vector<32x128xbf16>
    %cst = arith.constant dense<0.000000e+00> : vector<128x128xf32>
    %2 = tpu.matmul %0, %1, %cst {dimension_numbers = #tpu.dot_dimension_numbers<[1], [0], [0], [1], [0, 0, 1, 1], [], []>} : vector<128x32xbf16>, vector<32x128xbf16>, vector<128x128xf32> -> vector<128x128xf32>
    %c0_3 = arith.constant 0 : index
    %c0_4 = arith.constant 0 : index
    %3 = vector.load %arg3[%c0_3, %c0_4] : memref<1x128xf32, #tpu.memory_space<vmem>>, vector<1x128xf32>
    %4 = vector.broadcast %3 : vector<1x128xf32> to vector<128x128xf32>
    %5 = arith.addf %2, %4 : vector<128x128xf32>
    %cst_5 = arith.constant 0.000000e+00 : f32
    %6 = vector.broadcast %cst_5 : f32 to vector<128x128xf32>
    %7 = arith.maximumf %5, %6 : vector<128x128xf32>
    %8 = arith.truncf %7 : vector<128x128xf32> to vector<128x128xbf16>
    %c0_6 = arith.constant 0 : index
    %c0_7 = arith.constant 0 : index
    %9 = vector.load %arg4[%c0_6, %c0_7] : memref<128x128xbf16, #tpu.memory_space<vmem>>, vector<128x128xbf16>
    %cst_8 = arith.constant dense<0.000000e+00> : vector<128x128xf32>
    %10 = tpu.matmul %8, %9, %cst_8 {dimension_numbers = #tpu.dot_dimension_numbers<[1], [0], [0], [1], [0, 0, 1, 1], [], []>} : vector<128x128xbf16>, vector<128x128xbf16>, vector<128x128xf32> -> vector<128x128xf32>
    %c0_9 = arith.constant 0 : index
    %c0_10 = arith.constant 0 : index
    %11 = vector.load %arg5[%c0_9, %c0_10] : memref<1x128xf32, #tpu.memory_space<vmem>>, vector<1x128xf32>
    %12 = vector.broadcast %11 : vector<1x128xf32> to vector<128x128xf32>
    %13 = arith.addf %10, %12 : vector<128x128xf32>
    %cst_11 = arith.constant 0.000000e+00 : f32
    %14 = vector.broadcast %cst_11 : f32 to vector<128x128xf32>
    %15 = arith.maximumf %13, %14 : vector<128x128xf32>
    %c0_12 = arith.constant 0 : index
    %c0_13 = arith.constant 0 : index
    %16 = vector.load %arg6[%c0_12, %c0_13] : memref<1x128xbf16, #tpu.memory_space<vmem>>, vector<1x128xbf16>
    %17 = arith.truncf %15 : vector<128x128xf32> to vector<128x128xbf16>
    %18 = tpu.transpose %17, [1, 0] : vector<128x128xbf16> -> vector<128x128xbf16>
    %cst_14 = arith.constant dense<0.000000e+00> : vector<1x128xf32>
    %19 = tpu.matmul %16, %18, %cst_14 {dimension_numbers = #tpu.dot_dimension_numbers<[1], [0], [0], [1], [0, 0, 1, 1], [], []>} : vector<1x128xbf16>, vector<128x128xbf16>, vector<1x128xf32> -> vector<1x128xf32>
    %c0_15 = arith.constant 0 : index
    %c0_16 = arith.constant 0 : index
    %20 = vector.load %arg7[%c0_15, %c0_16] : memref<1x1xf32, #tpu.memory_space<vmem>>, vector<1x1xf32>
    %21 = vector.broadcast %20 : vector<1x1xf32> to vector<1x128xf32>
    %22 = arith.addf %19, %21 : vector<1x128xf32>
    %c0_17 = arith.constant 0 : index
    %c0_18 = arith.constant 0 : index
    %23 = vector.load %arg8[%c0_17, %c0_18] : memref<1x128xf32, #tpu.memory_space<vmem>>, vector<1x128xf32>
    tpu.vector_store %arg8[%c0_17, %c0_18], %22 {strides = array<i32>} : memref<1x128xf32, #tpu.memory_space<vmem>>, vector<1x128xf32>,
    %cst_19 = arith.constant 0.000000e+00 : f32
    %24 = vector.broadcast %cst_19 : f32 to vector<1x128xf32>
    %25 = arith.subf %24, %22 : vector<1x128xf32>
    %26 = math.exp %25 : vector<1x128xf32>
    %cst_20 = arith.constant 1.000000e+00 : f32
    %27 = vector.broadcast %cst_20 : f32 to vector<1x128xf32>
    %28 = arith.addf %27, %26 : vector<1x128xf32>
    %cst_21 = arith.constant 1.000000e+00 : f32
    %29 = vector.broadcast %cst_21 : f32 to vector<1x128xf32>
    %30 = arith.divf %29, %28 : vector<1x128xf32>
    %c0_22 = arith.constant 0 : index
    %c0_23 = arith.constant 0 : index
    %31 = vector.load %arg9[%c0_22, %c0_23] : memref<1x128xf32, #tpu.memory_space<vmem>>, vector<1x128xf32>
    tpu.vector_store %arg9[%c0_22, %c0_23], %30 {strides = array<i32>} : memref<1x128xf32, #tpu.memory_space<vmem>>, vector<1x128xf32>,
    return
  }
  func.func @transform_0(%arg0: i32) -> (i32, i32) {
    %c0_i32 = arith.constant 0 : i32
    %c0_i32_0 = arith.constant 0 : i32
    return %arg0, %c0_i32 : i32, i32
  }
  func.func @transform_1(%arg0: i32) -> (i32, i32) {
    %c0_i32 = arith.constant 0 : i32
    %c0_i32_0 = arith.constant 0 : i32
    %c0_i32_1 = arith.constant 0 : i32
    return %c0_i32, %c0_i32_0 : i32, i32
  }
  func.func @transform_2(%arg0: i32) -> (i32, i32) {
    %c0_i32 = arith.constant 0 : i32
    %c0_i32_0 = arith.constant 0 : i32
    %c0_i32_1 = arith.constant 0 : i32
    return %c0_i32, %c0_i32_0 : i32, i32
  }
  func.func @transform_3(%arg0: i32) -> (i32, i32) {
    %c0_i32 = arith.constant 0 : i32
    %c0_i32_0 = arith.constant 0 : i32
    %c0_i32_1 = arith.constant 0 : i32
    return %c0_i32, %c0_i32_0 : i32, i32
  }
  func.func @transform_4(%arg0: i32) -> (i32, i32) {
    %c0_i32 = arith.constant 0 : i32
    %c0_i32_0 = arith.constant 0 : i32
    %c0_i32_1 = arith.constant 0 : i32
    return %c0_i32, %c0_i32_0 : i32, i32
  }
  func.func @transform_5(%arg0: i32) -> (i32, i32) {
    %c0_i32 = arith.constant 0 : i32
    %c0_i32_0 = arith.constant 0 : i32
    %c0_i32_1 = arith.constant 0 : i32
    return %c0_i32, %c0_i32_0 : i32, i32
  }
  func.func @transform_6(%arg0: i32) -> (i32, i32) {
    %c0_i32 = arith.constant 0 : i32
    %c0_i32_0 = arith.constant 0 : i32
    %c0_i32_1 = arith.constant 0 : i32
    return %c0_i32, %c0_i32_0 : i32, i32
  }
  func.func @transform_7(%arg0: i32) -> (i32, i32) {
    %c0_i32 = arith.constant 0 : i32
    %c0_i32_0 = arith.constant 0 : i32
    return %c0_i32, %arg0 : i32, i32
  }
  func.func @transform_8(%arg0: i32) -> (i32, i32) {
    %c0_i32 = arith.constant 0 : i32
    %c0_i32_0 = arith.constant 0 : i32
    return %c0_i32, %arg0 : i32, i32
  }
}

</mosaic_0001>

<bundles_post_ra>
// kernel: mlp_binary_classifier.1
= control target key start
LH: loop header
LB: loop body
LE: loop exit
PB: predicated region body
PF: predicated region fallthrough
CT: control target
= control target key end

     0   :  { %vm107_vm0 = vcmask 261120   ;;  %s639_s1 = inlined_call_operand.vmem [shape: bf16[32,128], index: 1, kind: input, shape index: {}]   ;;  %s640_s2 = inlined_call_operand.vmem [shape: f32[1,128], index: 2, kind: input, shape index: {}]   ;;  %s641_s0 = inlined_call_operand.vmem [shape: bf16[128,32], index: 0, kind: input, shape index: {}]   ;;  %s642_s3 = inlined_call_operand.vmem [shape: bf16[128,128], index: 3, kind: input, shape index: {}]   ;;  %s643_s4 = inlined_call_operand.vmem [shape: f32[1,128], index: 4, kind: input, shape index: {}]   ;;  %s644_s6 = inlined_call_operand.<no memory space> [shape: f32[1,1], index: 6, kind: input, shape index: {}]   ;;  %s645_s5 = inlined_call_operand.vmem [shape: bf16[1,128], index: 5, kind: input, shape index: {}]   ;;  %s646_s7 = inlined_call_operand.vmem [shape: f32[1,128], index: 7, kind: output, shape index: {0}]   ;;  %s647_s8 = inlined_call_operand.vmem [shape: f32[1,128], index: 8, kind: output, shape index: {1}]  }
   0x1   :  { %v485_v0 = vld [vmem:[%s639_s1 + $0x8] sm:$0xff]  ;;  %v484_v1 = vld [vmem:[%s639_s1] sm:$0xff]  ;;  %v478_v4 = vld [vmem:[%s641_s0 + $0x10] sm:$0xff] }
   0x2   :  { %138 = vmatpush.bf16.msra.mxu0 %v485_v0  ;;  %v476_v2 = vld [vmem:[%s641_s0] sm:$0xff]  ;;  %v477_v3 = vld [vmem:[%s641_s0 + $0x8] sm:$0xff]  ;;  %v479_v5 = vld [vmem:[%s641_s0 + $0x18] sm:$0xff] }
   0x3   :  { %v480_v6 = vld [vmem:[%s641_s0 + $0x20] sm:$0xff]  ;;  %v493_v7 = vld [vmem:[%s642_s3 + $0x38] sm:$0xff]  ;;  %v481_v8 = vld [vmem:[%s641_s0 + $0x28] sm:$0xff] }
   0x4   :  { %273 = vmatpush.bf16.msra.mxu1 %v493_v7  ;;  %494 = vmatpush.bf16.msra.mxu3 %v493_v7  ;;  %v492_v9 = vld [vmem:[%s642_s3 + $0x30] sm:$0xff]  ;;  %v491_v10 = vld [vmem:[%s642_s3 + $0x28] sm:$0xff]  ;;  %v490_v11 = vld [vmem:[%s642_s3 + $0x20] sm:$0xff] }
   0x5   :  { %v489_v12 = vld [vmem:[%s642_s3 + $0x18] sm:$0xff]  ;;  %v482_v13 = vld [vmem:[%s641_s0 + $0x30] sm:$0xff]  ;;  %v487_v15 = vld [vmem:[%s642_s3 + $0x8] sm:$0xff] }
   0x6   :  { %139 = vmatpush.bf16.msra.mxu0 %v484_v1  ;;  %v488_v14 = vld [vmem:[%s642_s3 + $0x10] sm:$0xff]  ;;  %v486_v16 = vld [vmem:[%s642_s3] sm:$0xff]  ;;  %v483_v17 = vld [vmem:[%s641_s0 + $0x38] sm:$0xff] }
   0x7   :  { %v504_v19 = vld [vmem:[%s640_s2] ss:$0 sm:$0xff] }
   0x8   :  { %274 = vmatpush.bf16.msra.mxu1 %v492_v9  ;;  %495 = vmatpush.bf16.msra.mxu3 %v492_v9 }
   0x9   :  { %436 = vmatmul.msk.bf16.vlgmr.msra.gmra.mxu0 %vm107_vm0, %v476_v2 }
   0xc   :  { %275 = vmatpush.bf16.msra.mxu1 %v491_v10  ;;  %496 = vmatpush.bf16.msra.mxu3 %v491_v10 }
  0x10   :  { %276 = vmatpush.bf16.msra.mxu1 %v490_v11  ;;  %497 = vmatpush.bf16.msra.mxu3 %v490_v11 }
  0x14   :  { %277 = vmatpush.bf16.msra.mxu1 %v489_v12  ;;  %498 = vmatpush.bf16.msra.mxu3 %v489_v12  ;;  %v505_v12 = vld [vmem:[%s643_s4] ss:$0 sm:$0xff] }
  0x18   :  { %278 = vmatpush.bf16.msra.mxu1 %v488_v14  ;;  %499 = vmatpush.bf16.msra.mxu3 %v488_v14 }
  0x19   :  { %437 = vmatmul.msk.bf16.gmra.mxu0 %vm107_vm0, %v477_v3 }
  0x1c   :  { %279 = vmatpush.bf16.msra.mxu1 %v487_v15  ;;  %500 = vmatpush.bf16.msra.mxu3 %v487_v15 }
  0x20   :  { %280 = vmatpush.bf16.msra.mxu1 %v486_v16  ;;  %501 = vmatpush.bf16.msra.mxu3 %v486_v16 }
  0x29   :  { %438 = vmatmul.msk.bf16.gmra.mxu0 %vm107_vm0, %v478_v4 }
  0x39   :  { %439 = vmatmul.msk.bf16.gmra.mxu0 %vm107_vm0, %v479_v5 }
  0x49   :  { %440 = vmatmul.msk.bf16.gmra.mxu0 %vm107_vm0, %v480_v6 }
  0x59   :  { %441 = vmatmul.msk.bf16.gmra.mxu0 %vm107_vm0, %v481_v8 }
  0x69   :  { %442 = vmatmul.msk.bf16.gmra.mxu0 %vm107_vm0, %v482_v13 }
  0x79   :  { %443 = vmatmul.msk.bf16.gmra.mxu0 %vm107_vm0, %v483_v17 }
  0x86   :  { %v141_v18 = vpop.f32.mrf.mxu0 }
  0x87   :  { %v142_v20 = vadd.f32 %v504_v19, %v141_v18 }
  0x89   :  { %v181_v23 = vmax.f32 %v142_v20, 0.0 }
  0x8e   :  { %v143_v21 = vpop.f32.mrf.mxu0 }
  0x8f   :  { %v144_v22 = vadd.f32 %v504_v19, %v143_v21 }
  0x91   :  { %v182_v24 = vmax.f32 %v144_v22, 0.0 }
  0x93   :  { %v197_v25 = vpack.c.bf16 %v182_v24, %v181_v23 }
  0x95   :  { %281 = vmatmul.bf16.vlgmr.msra.gmra.mxu1 %v197_v25 }
  0x96   :  { %v146_v26 = vpop.f32.mrf.mxu0 }
  0x97   :  { %v147_v27 = vadd.f32 %v504_v19, %v146_v26 }
  0x99   :  { %v183_v30 = vmax.f32 %v147_v27, 0.0 }
  0x9e   :  { %v148_v28 = vpop.f32.mrf.mxu0 }
  0x9f   :  { %v149_v29 = vadd.f32 %v504_v19, %v148_v28 }
  0xa1   :  { %v184_v31 = vmax.f32 %v149_v29, 0.0 }
  0xa3   :  { %v198_v32 = vpack.c.bf16 %v184_v31, %v183_v30 }
  0xa5   :  { %286 = vmatmul.bf16.gmra.mxu1 %v198_v32 }
  0xa6   :  { %v151_v33 = vpop.f32.mrf.mxu0 }
  0xa7   :  { %v152_v34 = vadd.f32 %v504_v19, %v151_v33 }
  0xa9   :  { %v185_v37 = vmax.f32 %v152_v34, 0.0 }
  0xae   :  { %v153_v35 = vpop.f32.mrf.mxu0 }
  0xaf   :  { %v154_v36 = vadd.f32 %v504_v19, %v153_v35 }
  0xb1   :  { %v186_v38 = vmax.f32 %v154_v36, 0.0 }
  0xb3   :  { %v199_v39 = vpack.c.bf16 %v186_v38, %v185_v37 }
  0xb5   :  { %291 = vmatmul.bf16.gmra.mxu1 %v199_v39 }
  0xb6   :  { %v156_v40 = vpop.f32.mrf.mxu0 }
  0xb7   :  { %v157_v41 = vadd.f32 %v504_v19, %v156_v40 }
  0xb9   :  { %v187_v44 = vmax.f32 %v157_v41, 0.0 }
  0xbe   :  { %v158_v42 = vpop.f32.mrf.mxu0 }
  0xbf   :  { %v159_v43 = vadd.f32 %v504_v19, %v158_v42 }
  0xc1   :  { %v188_v45 = vmax.f32 %v159_v43, 0.0 }
  0xc3   :  { %v200_v46 = vpack.c.bf16 %v188_v45, %v187_v44 }
  0xc5   :  { %296 = vmatmul.bf16.gmra.mxu1 %v200_v46 }
  0xc6   :  { %v161_v47 = vpop.f32.mrf.mxu0 }
  0xc7   :  { %v162_v48 = vadd.f32 %v504_v19, %v161_v47 }
  0xc9   :  { %v189_v51 = vmax.f32 %v162_v48, 0.0 }
  0xce   :  { %v163_v49 = vpop.f32.mrf.mxu0 }
  0xcf   :  { %v164_v50 = vadd.f32 %v504_v19, %v163_v49 }
  0xd1   :  { %v190_v52 = vmax.f32 %v164_v50, 0.0 }
  0xd3   :  { %v201_v53 = vpack.c.bf16 %v190_v52, %v189_v51 }
  0xd5   :  { %301 = vmatmul.bf16.gmra.mxu1 %v201_v53 }
  0xd6   :  { %v166_v54 = vpop.f32.mrf.mxu0 }
  0xd7   :  { %v167_v55 = vadd.f32 %v504_v19, %v166_v54 }
  0xd9   :  { %v191_v58 = vmax.f32 %v167_v55, 0.0 }
  0xde   :  { %v168_v56 = vpop.f32.mrf.mxu0 }
  0xdf   :  { %v169_v57 = vadd.f32 %v504_v19, %v168_v56 }
  0xe1   :  { %v192_v59 = vmax.f32 %v169_v57, 0.0 }
  0xe3   :  { %v202_v60 = vpack.c.bf16 %v192_v59, %v191_v58 }
  0xe5   :  { %306 = vmatmul.bf16.vlgmr.msra.gmra.mxu3 %v202_v60 }
  0xe6   :  { %v171_v61 = vpop.f32.mrf.mxu0 }
  0xe7   :  { %v172_v62 = vadd.f32 %v504_v19, %v171_v61 }
  0xe9   :  { %v193_v1 = vmax.f32 %v172_v62, 0.0 }
  0xee   :  { %v173_v63 = vpop.f32.mrf.mxu0 }
  0xef   :  { %v174_v0 = vadd.f32 %v504_v19, %v173_v63 }
  0xf1   :  { %v194_v2 = vmax.f32 %v174_v0, 0.0  ;;  %v14_v0 = vstv %s644_s6 }
  0xf2   :  { %15 = vst [vmem:[#allocation2] sm:$0x1] %v14_v0 }
  0xf3   :  { %v203_v3 = vpack.c.bf16 %v194_v2, %v193_v1  ;;  %v510_v2 = vmov 0  }
  0xf4   :  { %503 = vset.pattern.permute.xlu0 %v510_v2 }
  0xf5   :  { %311 = vmatmul.bf16.gmra.mxu3 %v203_v3 }
  0xf6   :  { %v176_v4 = vpop.f32.mrf.mxu0 }
  0xf7   :  { %v177_v5 = vadd.f32 %v504_v19, %v176_v4 }
  0xf9   :  { %v195_v8 = vmax.f32 %v177_v5, 0.0 }
  0xfe   :  { %v178_v6 = vpop.f32.mrf.mxu0 }
  0xff   :  { %v179_v7 = vadd.f32 %v504_v19, %v178_v6  ;;  %v347_v6 = vld [vmem:[#allocation2] sm:$0x1] }
 0x100   :  { %350 = vperm.xlu0 %503, %v347_v6  }
 0x101   :  { %v196_v9 = vmax.f32 %v179_v7, 0.0  ;;  %v338_v7 = vld [vmem:[%s645_s5] sm:$0x1] }
 0x103   :  { %v204_v10 = vpack.c.bf16 %v196_v9, %v195_v8 }
 0x105   :  { %316 = vmatmul.bf16.gmra.mxu3 %v204_v10 }
 0x112   :  { %v282_v11 = vpop.f32.mrf.mxu1 }
 0x113   :  { %v283_v13 = vadd.f32 %v505_v12, %v282_v11 }
 0x115   :  { %v322_v16 = vmax.f32 %v283_v13, 0.0 }
 0x11a   :  { %v284_v14 = vpop.f32.mrf.mxu1 }
 0x11b   :  { %v285_v15 = vadd.f32 %v505_v12, %v284_v14 }
 0x11d   :  { %v323_v17 = vmax.f32 %v285_v15, 0.0 }
 0x11f   :  { %v624_v18 = vpack.c.bf16 %v323_v17, %v322_v16 }
 0x122   :  { %v287_v20 = vpop.f32.mrf.mxu1 }
 0x123   :  { %v288_v21 = vadd.f32 %v505_v12, %v287_v20 }
 0x125   :  { %v324_v23 = vmax.f32 %v288_v21, 0.0 }
 0x12a   :  { %v289_v22 = vpop.f32.mrf.mxu1 }
 0x12b   :  { %v290_v19 = vadd.f32 %v505_v12, %v289_v22 }
 0x12d   :  { %v325_v24 = vmax.f32 %v290_v19, 0.0 }
 0x12f   :  { %v340_v25 = vpack.c.bf16 %v325_v24, %v324_v23 }
 0x132   :  { %v292_v27 = vpop.f32.mrf.mxu1 }
 0x133   :  { %v293_v1 = vadd.f32 %v505_v12, %v292_v27 }
 0x135   :  { %v326_v4 = vmax.f32 %v293_v1, 0.0 }
 0x13a   :  { %v294_v30 = vpop.f32.mrf.mxu1 }
 0x13b   :  { %v295_v62 = vadd.f32 %v505_v12, %v294_v30 }
 0x13d   :  { %v327_v3 = vmax.f32 %v295_v62, 0.0 }
 0x13f   :  { %v341_v5 = vpack.c.bf16 %v327_v3, %v326_v4 }
 0x142   :  { %v297_v32 = vpop.f32.mrf.mxu1 }
 0x143   :  { %v298_v59 = vadd.f32 %v505_v12, %v297_v32 }
 0x145   :  { %v328_v61 = vmax.f32 %v298_v59, 0.0 }
 0x14a   :  { %v299_v34 = vpop.f32.mrf.mxu1 }
 0x14b   :  { %v300_v57 = vadd.f32 %v505_v12, %v299_v34 }
 0x14d   :  { %v329_v60 = vmax.f32 %v300_v57, 0.0 }
 0x14f   :  { %v342_v63 = vpack.c.bf16 %v329_v60, %v328_v61 }
 0x152   :  { %v302_v43 = vpop.f32.mrf.mxu1 }
 0x153   :  { %v303_v54 = vadd.f32 %v505_v12, %v302_v43 }
 0x155   :  { %v330_v56 = vmax.f32 %v303_v54, 0.0 }
 0x15a   :  { %v304_v50 = vpop.f32.mrf.mxu1 }
 0x15b   :  { %v305_v52 = vadd.f32 %v505_v12, %v304_v50 }
 0x15d   :  { %v331_v55 = vmax.f32 %v305_v52, 0.0 }
 0x15f   :  { %v343_v58 = vpack.c.bf16 %v331_v55, %v330_v56 }
 0x168   :  { %v307_v26 = vpop.f32.mrf.mxu3 }
 0x169   :  { %v308_v48 = vadd.f32 %v505_v12, %v307_v26 }
 0x16b   :  { %v332_v51 = vmax.f32 %v308_v48, 0.0 }
 0x170   :  { %v309_v28 = vpop.f32.mrf.mxu3 }
 0x171   :  { %v310_v46 = vadd.f32 %v505_v12, %v309_v28 }
 0x172   :  { %v351_v8 = vpop.permute.xlu0 %350 }
 0x173   :  { %v333_v49 = vmax.f32 %v310_v46, 0.0  ;;  %v353_v9 = vperm.slane %v351_v8, 0 }
 0x175   :  { %v344_v53 = vpack.c.bf16 %v333_v49, %v332_v51 }
 0x178   :  { %v312_v29 = vpop.f32.mrf.mxu3 }
 0x179   :  { %v313_v42 = vadd.f32 %v505_v12, %v312_v29 }
 0x17b   :  { %v334_v45 = vmax.f32 %v313_v42, 0.0 }
 0x180   :  { %v314_v31 = vpop.f32.mrf.mxu3 }
 0x181   :  { %v315_v40 = vadd.f32 %v505_v12, %v314_v31 }
 0x183   :  { %v335_v44 = vmax.f32 %v315_v40, 0.0 }
 0x185   :  { %v345_v47 = vpack.c.bf16 %v335_v44, %v334_v45 }
 0x188   :  { %v317_v33 = vpop.f32.mrf.mxu3 }
 0x189   :  { %v318_v35 = vadd.f32 %v505_v12, %v317_v33 }
 0x18b   :  { %v336_v38 = vmax.f32 %v318_v35, 0.0 }
 0x190   :  { %v319_v36 = vpop.f32.mrf.mxu3 }
 0x191   :  { %v320_v37 = vadd.f32 %v505_v12, %v319_v36 }
 0x193   :  { %v337_v39 = vmax.f32 %v320_v37, 0.0 }
 0x195   :  { %v346_v41 = vpack.c.bf16 %v337_v39, %v336_v38 }
 0x197   :  { %354 = vmatpush.bf16.xpose.msra.mxu2 %v346_v41 }
 0x19f   :  { %355 = vmatpush.bf16.xpose.msra.mxu2 %v345_v47 }
 0x1a7   :  { %356 = vmatpush.bf16.xpose.msra.mxu2 %v344_v53 }
 0x1af   :  { %357 = vmatpush.bf16.xpose.msra.mxu2 %v343_v58 }
 0x1b7   :  { %358 = vmatpush.bf16.xpose.msra.mxu2 %v342_v63 }
 0x1bf   :  { %359 = vmatpush.bf16.xpose.msra.mxu2 %v341_v5 }
 0x1c7   :  { %360 = vmatpush.bf16.xpose.msra.mxu2 %v340_v25 }
 0x1cf   :  { %361 = vmatpush.bf16.xpose.msra.mxu2 %v624_v18 }
 0x1d6   :  { %362 = vmatmul.bf16.vlgmr.msra.gmra.mxu2 %v338_v7 }
 0x259   :  { %v363_v10 = vpop.f32.mrf.mxu2 }
 0x25a   :  { %v364_v11 = vadd.f32 %v363_v10, %v353_v9 }
 0x25c   :  { %367 = vst [vmem:[%s646_s7] sm:$0x1] %v364_v11  ;;  %v368_v12 = vsub.f32 0.0, %v364_v11 }
 0x25e   :  { %v369_v13 = vmul.f32 1.442695, %v368_v12 }
 0x260   :  { %506 = vpow2.f32 %v369_v13 }
 0x261   :  { %v365_v14 = vpop.f32.mrf.mxu2 }
 0x266   :  { %v507_v15 = vpop.eup %506 }
 0x267   :  { %v371_v16 = vadd.f32 1.0, %v507_v15 }
 0x269   :  { %508 = vrcp.f32 %v371_v16  ;;  %v383_v21 = vand.u32 2147483648, %v371_v16  ;;  %v381_v19 = vand.u32 2147483647, %v371_v16  ;;  %vm377_vm2 = vweird.f32 %v371_v16 }
 0x26b   :  { %v384_v24 = vor.u32 1.1754944e-38, %v383_v21  ;;  %vm382_vm4 = vcmp.eq.f32.partialorder %v381_v19, 8.507059e+37 }
 0x26f   :  { %v509_v17 = vpop.eup %508 }
 0x270   :  { %v373_v18 = vmul.f32 %v509_v17, %v371_v16  ;;  %vm378_vm1 = vweird.f32 %v509_v17 }
 0x271   :  { %vm379_vm3 = vmor %vm377_vm2, %vm378_vm1 }
 0x272   :  { %v374_v20 = vsub.f32 1.0, %v373_v18 }
 0x274   :  { %v375_v22 = vmul.f32 %v509_v17, %v374_v20 }
 0x276   :  { %v376_v23 = vadd.f32 %v509_v17, %v375_v22 }
 0x278   :  { %v380_v25 = vsel %vm379_vm3, %v509_v17, %v376_v23 }
 0x279   :  { %v385_v26 = vsel %vm382_vm4, %v384_v24, %v380_v25 }
 0x27a   :  { %387 = vst [vmem:[%s647_s8] sm:$0x1] %v385_v26 }

</bundles_post_ra>
